<compile_context>
chip_gen: v6e
topology: v6e:2x2x1
jax: 0.10.0
libtpu: 0.0.40
codegen_flags: <defaults>
</compile_context>

<pallas_src>
import jax
import jax.numpy as jnp
from jax import lax
from jax.experimental import pallas as pl
from jax.experimental.pallas import tpu as pltpu


# --------------------------------------------------------------------------
# Pallas kernels (lane-dense, row-blocked elementwise ops)
# --------------------------------------------------------------------------

def _sst_kernel(theta_ref, x_ref, o_ref):
    # theta_ref: (r_blk, 1) f32; x_ref/o_ref: (r_blk, hw_blk).
    t = jnp.maximum(theta_ref[...], 0.0)                # clamp(theta, min=0) in f32
    xf = x_ref[...].astype(jnp.float32)
    o_ref[...] = (xf - jnp.clip(xf, -t, t)).astype(o_ref.dtype)   # == sign(x)*relu(|x|-t)


def _bn_sst_kernel(scale_ref, offset_ref, theta_ref, x_ref, o_ref):
    # Fused eval-mode BatchNorm (per-channel affine) + SST.
    t = jnp.maximum(theta_ref[...], 0.0)
    xf = x_ref[...].astype(jnp.float32) * scale_ref[...] + offset_ref[...]
    o_ref[...] = (xf - jnp.clip(xf, -t, t)).astype(o_ref.dtype)


# --------------------------------------------------------------------------
# Tiling helpers + launcher
# --------------------------------------------------------------------------

def _largest_divisor_multiple(dim, align, cap):
    """Largest d <= min(cap, dim) with d % align == 0 and dim % d == 0 (or None)."""
    best = None
    d = align
    limit = min(cap, dim)
    while d <= limit:
        if dim % d == 0:
            best = d
        d += align
    return best


def _choose_tiles(rows, lanes, dtype, target_tile_bytes):
    bpe = jnp.dtype(dtype).itemsize
    sub_align = {4: 8, 2: 16, 1: 32}.get(bpe, 8)
    # Lane (last-dim) block: multiple of 128 dividing `lanes`, sized by the byte
    # budget assuming at least `sub_align` rows; otherwise the full dim (legal).
    if lanes % 128 == 0:
        lane_cap = max(128, target_tile_bytes // (sub_align * bpe))
        hw_blk = _largest_divisor_multiple(lanes, 128, lane_cap) or lanes
    else:
        hw_blk = lanes
    # Row (second-to-last) block: multiple of sub_align dividing `rows`, filling
    # the remaining budget; otherwise the full dim (legal).
    if rows % sub_align == 0:
        row_cap = max(sub_align, target_tile_bytes // (hw_blk * bpe))
        r_blk = _largest_divisor_multiple(rows, sub_align, row_cap) or rows
    else:
        r_blk = rows
    return r_blk, hw_blk


def _launch_rowwise(kernel, row_params, x, *, target_tile_bytes=4 << 20,
                    vmem_limit_bytes=48 << 20):
    """Run an elementwise kernel on x viewed as (N*C, H*W) with per-row params.

    row_params: list of (N*C, 1) float32 arrays (threshold / scale / offset).
    """
    N, C, H, W = x.shape
    rows, lanes = N * C, H * W
    x2 = x.reshape(rows, lanes)
    r_blk, hw_blk = _choose_tiles(rows, lanes, x.dtype, target_tile_bytes)
    grid = (rows // r_blk, lanes // hw_blk)

    param_spec = pl.BlockSpec((r_blk, 1), lambda i, j: (i, 0))
    data_spec = pl.BlockSpec((r_blk, hw_blk), lambda i, j: (i, j))

    out = pl.pallas_call(
        kernel,
        out_shape=jax.ShapeDtypeStruct((rows, lanes), x.dtype),
        grid=grid,
        in_specs=[param_spec] * len(row_params) + [data_spec],
        out_specs=data_spec,
        compiler_params=pltpu.CompilerParams(
            dimension_semantics=("parallel", "parallel"),
            vmem_limit_bytes=vmem_limit_bytes),
    )(*row_params, x2)
    return out.reshape(N, C, H, W)


def _per_row(v_c, N):
    """(C,) per-channel vector -> (N*C, 1) per-row column (row = n*C + c)."""
    C = v_c.shape[0]
    return jnp.tile(v_c.astype(jnp.float32), (N,)).reshape(N * C, 1)


# --------------------------------------------------------------------------
# Module pieces
# --------------------------------------------------------------------------

def sst_forward(x, theta):
    """SST: y = sign(x) * relu(|x| - clamp(theta, 0)); theta (1, P, 1, 1), P in {1, C}."""
    N, C, H, W = x.shape
    theta_c = jnp.broadcast_to(theta[0, :, 0, 0].astype(jnp.float32), (C,))
    return _launch_rowwise(_sst_kernel, [_per_row(theta_c, N)], x)


def bn_sst_forward(x, gamma, beta, running_mean, running_var, eps, theta):
    """Eval-mode BatchNorm2d folded to per-channel affine, fused with SST."""
    # TODO(synk): training-mode BatchNorm (batch statistics) is not implemented;
    # eval-mode running-stats normalization is used here.
    N, C, H, W = x.shape
    inv = gamma.astype(jnp.float32) / jnp.sqrt(running_var.astype(jnp.float32) + eps)
    scale_c = inv
    offset_c = beta.astype(jnp.float32) - running_mean.astype(jnp.float32) * inv
    theta_c = jnp.broadcast_to(theta[0, :, 0, 0].astype(jnp.float32), (C,))
    return _launch_rowwise(
        _bn_sst_kernel,
        [_per_row(scale_c, N), _per_row(offset_c, N), _per_row(theta_c, N)], x)


def conv2d_same(x, w, b):
    # TODO(synk): the Conv2d stack is left to XLA (lax.conv_general_dilated);
    # no hand-written Pallas conv for these tiny-channel NCHW convolutions.
    k = w.shape[-1]
    p = (k - 1) // 2
    y = lax.conv_general_dilated(
        x, w, window_strides=(1, 1), padding=((p, p), (p, p)),
        dimension_numbers=("NCHW", "OIHW", "NCHW"))
    return y + b.reshape(1, -1, 1, 1)


def conv_encoder(x, enc_params):
    for w, b in enc_params:
        x = conv2d_same(x, w, b)
    return x


def dict_conv2d_forward(data, code, params):
    """Forward of DictConv2d(data, code) -> (data, code)."""
    enc = params["encoder"]
    dcode = conv_encoder(code, enc)
    res = data - dcode
    dres = conv_encoder(res, enc)
    code = code + dres
    code = bn_sst_forward(code, params["bn_gamma"], params["bn_beta"],
                          params["bn_mean"], params["bn_var"], params["bn_eps"],
                          params["theta"])
    data = conv_encoder(code, enc)
    data = sst_forward(data, params["theta"])
    return data, code


# --------------------------------------------------------------------------
# Pure-JAX reference
# --------------------------------------------------------------------------

def _sst_reference(x, theta):
    t = jnp.maximum(theta[0, :, 0, 0].astype(jnp.float32), 0.0).reshape(1, -1, 1, 1)
    xf = x.astype(jnp.float32)
    return (jnp.sign(xf) * jnp.maximum(jnp.abs(xf) - t, 0.0)).astype(x.dtype)


def _bn_reference(x, gamma, beta, mean, var, eps):
    xf = x.astype(jnp.float32)
    inv = (gamma / jnp.sqrt(var + eps)).reshape(1, -1, 1, 1)
    y = (xf - mean.reshape(1, -1, 1, 1)) * inv + beta.reshape(1, -1, 1, 1)
    return y.astype(x.dtype)


def reference_forward(data, code, params):
    enc = params["encoder"]
    dcode = conv_encoder(code, enc)
    res = data - dcode
    dres = conv_encoder(res, enc)
    code = code + dres
    code = _bn_reference(code, params["bn_gamma"], params["bn_beta"],
                         params["bn_mean"], params["bn_var"], params["bn_eps"])
    code = _sst_reference(code, params["theta"])
    data = conv_encoder(code, enc)
    data = _sst_reference(data, params["theta"])
    return data, code


# --------------------------------------------------------------------------

if __name__ == "__main__":
    key = jax.random.PRNGKey(0)
    # img_channels == in_channels == out_channels (required by the module), k=3.
    N, C, H, W, K = 2, 4, 16, 16, 3
    ks = jax.random.split(key, 10)

    data = jax.random.normal(ks[0], (N, C, H, W), dtype=jnp.float32)
    code = jax.random.normal(ks[1], (N, C, H, W), dtype=jnp.float32)

    # conv_encoder: num_convs=2 -> two 3x3 'same' convs with bias (C -> C -> C).
    enc = [
        (0.1 * jax.random.normal(ks[2], (C, C, K, K), jnp.float32),
         0.1 * jax.random.normal(ks[3], (C,), jnp.float32)),
        (0.1 * jax.random.normal(ks[4], (C, C, K, K), jnp.float32),
         0.1 * jax.random.normal(ks[5], (C,), jnp.float32)),
    ]
    params = dict(
        encoder=enc,
        bn_gamma=1.0 + 0.1 * jax.random.normal(ks[6], (C,), jnp.float32),
        bn_beta=0.1 * jax.random.normal(ks[7], (C,), jnp.float32),
        bn_mean=0.1 * jax.random.normal(ks[8], (C,), jnp.float32),
        bn_var=1.0 + 0.1 * jax.random.uniform(ks[9], (C,), jnp.float32),
        bn_eps=1e-5,
        theta=jnp.full((1, C, 1, 1), 0.001, jnp.float32),  # SST(out_channels, init=0.001)
    )

    data_out, code_out = dict_conv2d_forward(data, code, params)
    data_out, code_out = jax.block_until_ready((data_out, code_out))

    data_ref, code_ref = reference_forward(data, code, params)
    assert data_out.shape == data.shape and data_out.dtype == data.dtype
    assert code_out.shape == code.shape and code_out.dtype == code.dtype
    assert jnp.allclose(code_out, code_ref, rtol=1e-4, atol=1e-5), "code mismatch vs reference"
    assert jnp.allclose(data_out, data_ref, rtol=1e-4, atol=1e-5), "data mismatch vs reference"

    print("KERNEL_OK")
</pallas_src>

<mosaic_0001>
module attributes {stable_mosaic.version = 11 : i64} {
  func.func @_bn_sst_kernel(%arg0: i32, %arg1: i32, %arg2: memref<8x1xf32, #tpu.memory_space<vmem>>, %arg3: memref<8x1xf32, #tpu.memory_space<vmem>>, %arg4: memref<8x1xf32, #tpu.memory_space<vmem>>, %arg5: memref<8x256xf32, #tpu.memory_space<vmem>>, %arg6: memref<8x256xf32, #tpu.memory_space<vmem>>) attributes {dimension_semantics = [#tpu.dimension_semantics<parallel>, #tpu.dimension_semantics<parallel>], iteration_bounds = array<i64: 1, 1>, scalar_prefetch = 0 : i64, scratch_operands = 0 : i64, tpu.core_type = #tpu.core_type<tc>, window_params = [{transform_indices = @transform_0, window_bounds = array<i64: 8, 1>}, {transform_indices = @transform_1, window_bounds = array<i64: 8, 1>}, {transform_indices = @transform_2, window_bounds = array<i64: 8, 1>}, {transform_indices = @transform_3, window_bounds = array<i64: 8, 256>}, {transform_indices = @transform_4, window_bounds = array<i64: 8, 256>}]} {
    %c0 = arith.constant 0 : index
    %c0_0 = arith.constant 0 : index
    %0 = vector.load %arg4[%c0, %c0_0] : memref<8x1xf32, #tpu.memory_space<vmem>>, vector<8x1xf32>
    %cst = arith.constant 0.000000e+00 : f32
    %1 = vector.broadcast %cst : f32 to vector<8x1xf32>
    %2 = arith.maximumf %0, %1 : vector<8x1xf32>
    %c0_1 = arith.constant 0 : index
    %c0_2 = arith.constant 0 : index
    %3 = vector.load %arg5[%c0_1, %c0_2] : memref<8x256xf32, #tpu.memory_space<vmem>>, vector<8x256xf32>
    %c0_3 = arith.constant 0 : index
    %c0_4 = arith.constant 0 : index
    %4 = vector.load %arg2[%c0_3, %c0_4] : memref<8x1xf32, #tpu.memory_space<vmem>>, vector<8x1xf32>
    %5 = vector.broadcast %4 : vector<8x1xf32> to vector<8x256xf32>
    %6 = arith.mulf %3, %5 : vector<8x256xf32>
    %c0_5 = arith.constant 0 : index
    %c0_6 = arith.constant 0 : index
    %7 = vector.load %arg3[%c0_5, %c0_6] : memref<8x1xf32, #tpu.memory_space<vmem>>, vector<8x1xf32>
    %8 = vector.broadcast %7 : vector<8x1xf32> to vector<8x256xf32>
    %9 = arith.addf %6, %8 : vector<8x256xf32>
    %cst_7 = arith.constant 0.000000e+00 : f32
    %10 = vector.broadcast %cst_7 : f32 to vector<8x1xf32>
    %11 = arith.subf %10, %2 : vector<8x1xf32>
    %12 = vector.broadcast %11 : vector<8x1xf32> to vector<8x256xf32>
    %13 = arith.maximumf %12, %9 : vector<8x256xf32>
    %14 = vector.broadcast %2 : vector<8x1xf32> to vector<8x256xf32>
    %15 = arith.minimumf %14, %13 : vector<8x256xf32>
    %16 = arith.subf %9, %15 : vector<8x256xf32>
    %c0_8 = arith.constant 0 : index
    %c0_9 = arith.constant 0 : index
    %17 = vector.load %arg6[%c0_8, %c0_9] : memref<8x256xf32, #tpu.memory_space<vmem>>, vector<8x256xf32>
    tpu.vector_store %arg6[%c0_8, %c0_9], %16 {strides = array<i32>} : memref<8x256xf32, #tpu.memory_space<vmem>>, vector<8x256xf32>,
    return
  }
  func.func @transform_0(%arg0: i32, %arg1: i32) -> (i32, i32) {
    %c0_i32 = arith.constant 0 : i32
    %c0_i32_0 = arith.constant 0 : i32
    return %arg0, %c0_i32 : i32, i32
  }
  func.func @transform_1(%arg0: i32, %arg1: i32) -> (i32, i32) {
    %c0_i32 = arith.constant 0 : i32
    %c0_i32_0 = arith.constant 0 : i32
    return %arg0, %c0_i32 : i32, i32
  }
  func.func @transform_2(%arg0: i32, %arg1: i32) -> (i32, i32) {
    %c0_i32 = arith.constant 0 : i32
    %c0_i32_0 = arith.constant 0 : i32
    return %arg0, %c0_i32 : i32, i32
  }
  func.func @transform_3(%arg0: i32, %arg1: i32) -> (i32, i32) {
    %c0_i32 = arith.constant 0 : i32
    return %arg0, %arg1 : i32, i32
  }
  func.func @transform_4(%arg0: i32, %arg1: i32) -> (i32, i32) {
    %c0_i32 = arith.constant 0 : i32
    return %arg0, %arg1 : i32, i32
  }
}

</mosaic_0001>

<bundles_post_ra>
// kernel: tpu_custom_call.1
= control target key start
LH: loop header
LB: loop body
LE: loop exit
PB: predicated region body
PF: predicated region fallthrough
CT: control target
= control target key end

     0   :  { %v97_v2 = vmov 0   ;;  %s142_s0 = inlined_call_operand.vmem [shape: f32[8,1], index: 0, kind: input, shape index: {}]   ;;  %s143_s1 = inlined_call_operand.vmem [shape: f32[8,1], index: 1, kind: input, shape index: {}]   ;;  %s144_s2 = inlined_call_operand.vmem [shape: f32[8,1], index: 2, kind: input, shape index: {}]   ;;  %s145_s3 = inlined_call_operand.vmem [shape: f32[8,256], index: 3, kind: input, shape index: {}]   ;;  %s146_s4 = inlined_call_operand.hbm [shape: f32[8,256], index: 4, kind: output, shape index: {}]  }
   0x1   :  { %v22_v0 = vld [vmem:[%s142_s0] sm:$0xff]  ;;  %73 = vset.pattern.permute.xlu0 %v97_v2  ;;  %74 = vset.pattern.permute.xlu1 %v97_v2 }
   0x2   :  { %v18_v1 = vld [vmem:[%s144_s2] sm:$0xff] }
   0x3   :  { %v19_v3 = vmax.f32 %v18_v1, 0.0 }
   0x4   :  { %9 = vsyncpa [#allocation3], 0  ;;  %25 = vperm.xlu0 %73, %v22_v0   ;;  %v30_v5 = vld [vmem:[%s143_s1] sm:$0xff]  ;;  %v21_v8 = vld [vmem:[%s145_s3 + $0x8] sm:$0xff]  ;;  %s98_s1 = smov [#allocation2]  }
   0x5   :  { %v38_v4 = vsub.f32 0.0, %v19_v3  ;;  %v20_v7 = vld [vmem:[%s145_s3] sm:$0xff]  ;;  %s63_s23 = sshll.u32 %s98_s1, 4  ;;  %s64_s23 = int_to_ptr.vmem [resolvable:$true] %s63_s23 }
   0x6   :  { %s75_s24 = scalar_lea.vmem %s64_s23, 256  ;;  %p80_p1 = scmp.lt.s32.totalorder %s64_s23, %s64_s23 }
   0x7   :  { %41 = vperm.xlu1 %74, %v38_v4   ;;  %p76_p0 = scmp.ne.s32.totalorder %s64_s23, %s75_s24  ;;  %p81_p2 = scmp.lt.s32.totalorder %s75_s24, %s75_s24 }
   0x8   :  { %33 = vperm.xlu0 %73, %v30_v5  }
   0x9   :  { %p82_p3 = por %p81_p2, %p80_p1 }
   0xb   :  { %48 = vperm.xlu1 %74, %v19_v3   ;;  %p83_p4 = pnand %p82_p3, %p76_p0 }
  0x7f   :  { %v26_v6 = vpop.permute.xlu0 %25 }
  0x80   :  { %v28_v9 = vmul.f32 %v26_v6, %v20_v7  ;;  %v29_v10 = vmul.f32 %v26_v6, %v21_v8 }
  0x82   :  { %v42_v11 = vpop.permute.xlu1 %41 }
  0x83   :  { %v34_v12 = vpop.permute.xlu0 %33 }
  0x84   :  { %v36_v13 = vadd.f32 %v34_v12, %v28_v9  ;;  %v37_v14 = vadd.f32 %v34_v12, %v29_v10 }
  0x86   :  { %v44_v15 = vmax.f32 %v42_v11, %v36_v13  ;;  %v45_v16 = vmax.f32 %v42_v11, %v37_v14  ;;  %v49_v17 = vpop.permute.xlu1 %48 }
  0x88   :  { %v51_v18 = vmin.f32 %v49_v17, %v44_v15  ;;  %v52_v19 = vmin.f32 %v49_v17, %v45_v16 }
  0x8a   :  { %v53_v20 = vsub.f32 %v36_v13, %v51_v18  ;;  %v54_v21 = vsub.f32 %v37_v14, %v52_v19 }
  0x8c   :  { %55 = vst [vmem:[#allocation2] sm:$0xff] %v53_v20  ;;  %56 = vst [vmem:[#allocation2 + $0x8] sm:$0xff] %v54_v21 }
  0x8d   :  { %86 = shalt.err (!%p83_p4)
}
  0x8e   :  { %66 = dma.vmem_to_hbm [thread:$0]  %s64_s23, 256, %s146_s4, [#allocation3]  }
  0x8f   :  { %95 = dma.done.wait [#allocation3], 256  }
  0x90   :  { %96 = vsyncadd [#allocation3], 4294967040 }
  0x91   :  { %70 = vsyncpa [#allocation3], 1 }

</bundles_post_ra>
